<compile_context>
chip_gen: v6e
topology: v6e:2x2x1
jax: 0.10.0
libtpu: 0.0.40
codegen_flags: <defaults>
</compile_context>

<pallas_src>
import functools
import math

import jax
import jax.numpy as jnp
import numpy as np
from jax.experimental import pallas as pl
from jax.experimental.pallas import tpu as pltpu


def _round_up(x, m):
    return ((x + m - 1) // m) * m


# ------------------------------------------------------------------ tile-size selection


def _choose_m(M):
    m16 = _round_up(M, 16)            # bf16 sublane packing
    if m16 <= 512:
        return m16, m16
    tm = 256
    return _round_up(M, tm), tm


def _choose_n(N):
    n128 = _round_up(N, 128)
    if n128 <= 512:
        return n128, n128
    tn = 256
    return _round_up(N, tn), tn


def _choose_k(K):
    k128 = _round_up(K, 128)
    if k128 <= 1024:
        return k128, k128
    best_tk, best_pad = None, None
    for cand in (512, 384, 256):      # pick the tk that minimizes K padding
        kp = _round_up(K, cand)
        if best_pad is None or kp < best_pad:
            best_tk, best_pad = cand, kp
    return best_pad, best_tk


def _mm_vmem_bytes(tm, tn, tk, has_residual):
    b = 2 * (tm * tk * 2 + tk * tn * 2 + tn * 4)      # double-buffered A, B, bias tiles
    b += 2 * tm * tn * 4                              # resident f32 output + writeback
    if has_residual:
        b += 2 * tm * tn * 4
    b = int(b * 1.5) + (2 << 20)                      # headroom for compiler scratch
    return max(min(b, 48 * 1024 * 1024), 4 * 1024 * 1024)


# ------------------------------------------------------------------ Pallas kernels


def _gelu_tanh(x):
    c = 0.7978845608028654  # sqrt(2/pi)
    return 0.5 * x * (1.0 + jnp.tanh(c * (x + 0.044715 * x * x * x)))


def _mm_kernel(a_ref, b_ref, bias_ref, *rest, activation, has_residual):
    """Tiled matmul, f32 accumulation directly in the resident output block.

    Epilogue (at last K step): + bias, optional GELU, optional residual add.
    """
    if has_residual:
        res_ref, o_ref = rest
    else:
        (o_ref,) = rest
    k = pl.program_id(2)

    @pl.when(k == 0)
    def _init():
        o_ref[...] = jnp.zeros_like(o_ref)

    o_ref[...] += jnp.dot(a_ref[...], b_ref[...], preferred_element_type=jnp.float32)

    @pl.when(k == pl.num_programs(2) - 1)
    def _finalize():
        y = o_ref[...] + bias_ref[...]
        if activation == "gelu":
            y = _gelu_tanh(y)
        if has_residual:
            y = y + res_ref[...]
        o_ref[...] = y


def _ln_kernel(x_ref, o_ref, *, c_valid, eps):
    """Channel LayerNorm (gamma=1, beta=0) over the last dim, masking padded channels."""
    x = x_ref[...]
    lane = jax.lax.broadcasted_iota(jnp.int32, x.shape, 1)
    mask = lane < c_valid
    xm = jnp.where(mask, x, 0.0)
    mean = jnp.sum(xm, axis=-1, keepdims=True) * (1.0 / c_valid)
    d = jnp.where(mask, x - mean, 0.0)
    var = jnp.sum(d * d, axis=-1, keepdims=True) * (1.0 / c_valid)
    inv = jax.lax.rsqrt(var + eps)
    o_ref[...] = d * inv


def _attn_kernel(q_ref, k_ref, v_ref, o_ref, *, scale, lk_valid):
    """Scaled dot-product attention for one (batch, head) slice."""
    q = q_ref[0]                                   # (Lq_pad, d_pad) bf16
    k = k_ref[0]                                   # (Lk_pad, d_pad) bf16
    v = v_ref[0]
    s = jax.lax.dot_general(q, k, (((1,), (1,)), ((), ())),
                            preferred_element_type=jnp.float32) * scale
    kv_idx = jax.lax.broadcasted_iota(jnp.int32, s.shape, 1)
    s = jnp.where(kv_idx < lk_valid, s, -1e30)     # mask padded keys
    m = jnp.max(s, axis=-1, keepdims=True)
    p = jnp.exp(s - m)
    denom = jnp.sum(p, axis=-1, keepdims=True)
    p = p / denom
    o = jnp.dot(p.astype(jnp.bfloat16), v, preferred_element_type=jnp.float32)
    o_ref[...] = o[None]


def _dw_kernel(x_ref, w_ref, b_ref, o_ref, *, H, W):
    """Depthwise 3x3 conv (stride 1, pad 1 applied outside), one batch image per step."""
    x = x_ref[0]                                   # (H+2, W+2, Cp) f32
    w = w_ref[...]                                 # (9, Cp)
    acc = jnp.zeros((H, W, x.shape[-1]), jnp.float32)
    for t in range(9):
        i, j = t // 3, t % 3
        wt = jnp.reshape(w[t:t + 1, :], (1, 1, -1))
        acc = acc + x[i:i + H, j:j + W, :] * wt
    bias = jnp.reshape(b_ref[...], (1, 1, -1))
    o_ref[...] = (acc + bias)[None]


# ------------------------------------------------------------------ cached pallas_call builders


@functools.lru_cache(maxsize=None)
def _mm_call(M_pad, N_pad, K_pad, tm, tn, tk, activation, has_residual):
    kernel = functools.partial(_mm_kernel, activation=activation, has_residual=has_residual)
    in_specs = [
        pl.BlockSpec((tm, tk), lambda i, j, k: (i, k)),
        pl.BlockSpec((tk, tn), lambda i, j, k: (k, j)),
        pl.BlockSpec((1, tn), lambda i, j, k: (0, j)),
    ]
    if has_residual:
        in_specs.append(pl.BlockSpec((tm, tn), lambda i, j, k: (i, j)))
    f = pl.pallas_call(
        kernel,
        out_shape=jax.ShapeDtypeStruct((M_pad, N_pad), jnp.float32),
        grid_spec=pltpu.PrefetchScalarGridSpec(
            num_scalar_prefetch=0,
            grid=(M_pad // tm, N_pad // tn, K_pad // tk),
            in_specs=in_specs,
            out_specs=pl.BlockSpec((tm, tn), lambda i, j, k: (i, j)),
        ),
        compiler_params=pltpu.CompilerParams(
            dimension_semantics=("parallel", "parallel", "arbitrary"),
            vmem_limit_bytes=_mm_vmem_bytes(tm, tn, tk, has_residual),
        ),
    )
    return jax.jit(f)


@functools.lru_cache(maxsize=None)
def _ln_call(M_pad, C_pad, tm, c_valid, eps):
    kernel = functools.partial(_ln_kernel, c_valid=c_valid, eps=eps)
    f = pl.pallas_call(
        kernel,
        out_shape=jax.ShapeDtypeStruct((M_pad, C_pad), jnp.float32),
        grid_spec=pltpu.PrefetchScalarGridSpec(
            num_scalar_prefetch=0,
            grid=(M_pad // tm,),
            in_specs=[pl.BlockSpec((tm, C_pad), lambda i: (i, 0))],
            out_specs=pl.BlockSpec((tm, C_pad), lambda i: (i, 0)),
        ),
        compiler_params=pltpu.CompilerParams(dimension_semantics=("parallel",)),
    )
    return jax.jit(f)


@functools.lru_cache(maxsize=None)
def _attn_call(BH, Lq_pad, Lk_pad, d_pad, lk_valid, scale):
    kernel = functools.partial(_attn_kernel, scale=scale, lk_valid=lk_valid)
    f = pl.pallas_call(
        kernel,
        out_shape=jax.ShapeDtypeStruct((BH, Lq_pad, d_pad), jnp.float32),
        grid_spec=pltpu.PrefetchScalarGridSpec(
            num_scalar_prefetch=0,
            grid=(BH,),
            in_specs=[pl.BlockSpec((1, Lq_pad, d_pad), lambda b: (b, 0, 0)),
                      pl.BlockSpec((1, Lk_pad, d_pad), lambda b: (b, 0, 0)),
                      pl.BlockSpec((1, Lk_pad, d_pad), lambda b: (b, 0, 0))],
            out_specs=pl.BlockSpec((1, Lq_pad, d_pad), lambda b: (b, 0, 0)),
        ),
        compiler_params=pltpu.CompilerParams(dimension_semantics=("parallel",)),
    )
    return jax.jit(f)


@functools.lru_cache(maxsize=None)
def _dw_call(N, H, W, C_pad):
    kernel = functools.partial(_dw_kernel, H=H, W=W)
    f = pl.pallas_call(
        kernel,
        out_shape=jax.ShapeDtypeStruct((N, H, W, C_pad), jnp.float32),
        grid_spec=pltpu.PrefetchScalarGridSpec(
            num_scalar_prefetch=0,
            grid=(N,),
            in_specs=[pl.BlockSpec((1, H + 2, W + 2, C_pad), lambda b: (b, 0, 0, 0)),
                      pl.BlockSpec((9, C_pad), lambda b: (0, 0)),
                      pl.BlockSpec((1, C_pad), lambda b: (0, 0))],
            out_specs=pl.BlockSpec((1, H, W, C_pad), lambda b: (b, 0, 0, 0)),
        ),
        compiler_params=pltpu.CompilerParams(dimension_semantics=("parallel",)),
    )
    return jax.jit(f)


# ------------------------------------------------------------------ op wrappers (JAX glue)


def matmul(a, b, bias, activation=None, residual=None):
    """out = act(a @ b + bias) (+ residual); bf16 MXU inputs, f32 accumulation."""
    M, K = a.shape
    _, N = b.shape
    M_pad, tm = _choose_m(M)
    N_pad, tn = _choose_n(N)
    K_pad, tk = _choose_k(K)
    a_p = jnp.pad(a.astype(jnp.bfloat16), ((0, M_pad - M), (0, K_pad - K)))
    b_p = jnp.pad(b.astype(jnp.bfloat16), ((0, K_pad - K), (0, N_pad - N)))
    bias_p = jnp.pad(bias.astype(jnp.float32).reshape(1, N), ((0, 0), (0, N_pad - N)))
    args = [a_p, b_p, bias_p]
    has_res = residual is not None
    if has_res:
        args.append(jnp.pad(residual.astype(jnp.float32),
                            ((0, M_pad - M), (0, N_pad - N))))
    fn = _mm_call(M_pad, N_pad, K_pad, tm, tn, tk, activation or "none", has_res)
    out = fn(*args)
    return out[:M, :N]


def layernorm_channels(x, eps=1e-5):
    """LayerNorm over the channel dim of NHWC x, gamma=1, beta=0 (fresh-LN semantics)."""
    N, H, W, C = x.shape
    M = N * H * W
    M8 = _round_up(M, 8)
    if M8 <= 512:
        M_pad, tm = M8, M8
    else:
        tm = 512
        M_pad = _round_up(M, tm)
    C_pad = _round_up(C, 128)
    xp = jnp.pad(x.reshape(M, C).astype(jnp.float32), ((0, M_pad - M), (0, C_pad - C)))
    out = _ln_call(M_pad, C_pad, tm, C, float(eps))(xp)
    return out[:M, :C].reshape(N, H, W, C)


def conv3x3_s2_embed(x, w, b):
    """OverlapPatchEmbedding (Unfold k=3,s=2,p=1 + 1x1 conv) == 3x3 s2 p1 conv. NHWC."""
    N, H, W, Cin = x.shape
    Cout = w.shape[0]
    Ho = (H + 2 - 3) // 2 + 1
    Wo = (W + 2 - 3) // 2 + 1
    xp = jnp.pad(x, ((0, 0), (1, 1), (1, 1), (0, 0)))
    patches = []
    for ki in range(3):
        for kj in range(3):
            patches.append(xp[:, ki: ki + 2 * (Ho - 1) + 1: 2,
                              kj: kj + 2 * (Wo - 1) + 1: 2, :])
    a = jnp.concatenate(patches, axis=-1).reshape(N * Ho * Wo, 9 * Cin)
    bmat = jnp.transpose(w, (2, 3, 1, 0)).reshape(9 * Cin, Cout)
    out = matmul(a, bmat, b)
    return out.reshape(N, Ho, Wo, Cout)


def conv_reduce(x, w, b, R):
    """Conv2d(dim, dim, kernel=R, stride=R): non-overlapping patches -> pure reshape+matmul."""
    N, H, W, C = x.shape
    Cout = w.shape[0]
    if R == 1:
        a = x.reshape(N * H * W, C)
        bmat = w.reshape(Cout, C).T
        Ho, Wo = H, W
    else:
        Ho, Wo = H // R, W // R
        a = x.reshape(N, Ho, R, Wo, R, C).transpose(0, 1, 3, 2, 4, 5).reshape(
            N * Ho * Wo, R * R * C)
        bmat = jnp.transpose(w, (2, 3, 1, 0)).reshape(R * R * C, Cout)
    out = matmul(a, bmat, b)
    return out.reshape(N, Ho, Wo, Cout)


def depthwise_conv3x3(x, w, b):
    """Depthwise 3x3, stride 1, pad 1 on NHWC x.  w: (C,3,3), b: (C,)."""
    N, H, W, C = x.shape
    C_pad = _round_up(C, 128)
    xp = jnp.pad(x.astype(jnp.float32), ((0, 0), (1, 1), (1, 1), (0, C_pad - C)))
    wp = jnp.pad(jnp.transpose(w, (1, 2, 0)).reshape(9, C), ((0, 0), (0, C_pad - C)))
    bp = jnp.pad(b.reshape(1, C), ((0, 0), (0, C_pad - C)))
    out = _dw_call(N, H, W, C_pad)(xp, wp, bp)
    return out[..., :C]


def multihead_attention(q, k, v, n_heads):
    """nn.MultiheadAttention core (already-projected q,k,v): per-head softmax attention."""
    N, Lq, C = q.shape
    Lk = k.shape[1]
    d = C // n_heads
    scale = 1.0 / math.sqrt(d)

    def split_heads(t, L):
        return t.reshape(N, L, n_heads, d).transpose(0, 2, 1, 3).reshape(N * n_heads, L, d)

    qh, kh, vh = split_heads(q, Lq), split_heads(k, Lk), split_heads(v, Lk)
    Lq_pad = _round_up(Lq, 16)
    Lk_pad = _round_up(Lk, 16)
    d_pad = _round_up(d, 128)
    qh = jnp.pad(qh.astype(jnp.bfloat16), ((0, 0), (0, Lq_pad - Lq), (0, d_pad - d)))
    kh = jnp.pad(kh.astype(jnp.bfloat16), ((0, 0), (0, Lk_pad - Lk), (0, d_pad - d)))
    vh = jnp.pad(vh.astype(jnp.bfloat16), ((0, 0), (0, Lk_pad - Lk), (0, d_pad - d)))
    out = _attn_call(N * n_heads, Lq_pad, Lk_pad, d_pad, Lk, scale)(qh, kh, vh)
    out = out[:, :Lq, :d]
    return out.reshape(N, n_heads, Lq, d).transpose(0, 2, 1, 3).reshape(N, Lq, C)


# ------------------------------------------------------------------ MiT blocks


def attention_block(x, p, n_heads, R):
    """x = EfficientMSA(x) + x   (residual fused into the out-projection epilogue)."""
    N, H, W, C = x.shape
    M = N * H * W
    ln = layernorm_channels(x)
    kr = conv_reduce(ln, p["wk_conv"], p["bk_conv"], R)
    vr = conv_reduce(ln, p["wv_conv"], p["bv_conv"], R)
    Lk = kr.shape[1] * kr.shape[2]
    q = matmul(ln.reshape(M, C), p["wq"].T, p["bq"]).reshape(N, H * W, C)
    k = matmul(kr.reshape(N * Lk, C), p["wk"].T, p["bk"]).reshape(N, Lk, C)
    v = matmul(vr.reshape(N * Lk, C), p["wv"].T, p["bv"]).reshape(N, Lk, C)
    attn = multihead_attention(q, k, v, n_heads)                    # (N, H*W, C)
    out = matmul(attn.reshape(M, C), p["wo"].T, p["bo"], residual=x.reshape(M, C))
    return out.reshape(N, H, W, C)


def mixffn_block(x, p):
    """x = MixFFN(x) + x   (residual fused into the final 1x1-conv epilogue)."""
    N, H, W, C = x.shape
    M = N * H * W
    latent = p["w1"].shape[0]
    ln = layernorm_channels(x)
    h1 = matmul(ln.reshape(M, C), p["w1"].T, p["b1"]).reshape(N, H, W, latent)
    h2 = depthwise_conv3x3(h1, p["w_dw"], p["b_dw"])
    h3 = matmul(h2.reshape(M, latent), p["w_pw"].T, p["b_pw"], activation="gelu")
    out = matmul(h3, p["w2"].T, p["b2"], residual=x.reshape(M, C))
    return out.reshape(N, H, W, C)


def mit_forward(x_nchw, params):
    """Matches MiT.forward: returns a list of per-stage outputs (NCHW)."""
    x = jnp.transpose(x_nchw, (0, 2, 3, 1)).astype(jnp.float32)     # NCHW -> NHWC
    layer_outputs = []
    for stage in params["stages"]:
        x = conv3x3_s2_embed(x, stage["embed_w"], stage["embed_b"])
        for layer in stage["layers"]:
            x = attention_block(x, layer["attn"], stage["n_heads"], stage["reduction"])
            x = mixffn_block(x, layer["ffn"])
        layer_outputs.append(jnp.transpose(x, (0, 3, 1, 2)))        # back to NCHW
    return layer_outputs


# ------------------------------------------------------------------ parameter init


class _KeyGen:
    def __init__(self, key):
        self.key = key

    def __call__(self):
        self.key, sub = jax.random.split(self.key)
        return sub


def _w(kg, shape):
    fan_in = int(np.prod(shape[1:]))
    std = 1.0 / math.sqrt(fan_in)
    return (jax.random.normal(kg(), shape, jnp.float32) * std).astype(jnp.float32)


def _b(kg, n):
    return (0.02 * jax.random.normal(kg(), (n,), jnp.float32)).astype(jnp.float32)


def init_mit_params(key, channels, dims, n_heads, expansion, reduction_ratio, n_layers):
    kg = _KeyGen(key)
    dims_all = (channels,) + tuple(dims)
    stages = []
    for idx, (in_dim, out_dim) in enumerate(zip(dims_all[:-1], dims_all[1:])):
        R = reduction_ratio[idx]
        latent = out_dim * expansion[idx]
        layers = []
        for _ in range(n_layers[idx]):
            attn = {
                "wk_conv": _w(kg, (out_dim, out_dim, R, R)), "bk_conv": _b(kg, out_dim),
                "wv_conv": _w(kg, (out_dim, out_dim, R, R)), "bv_conv": _b(kg, out_dim),
                "wq": _w(kg, (out_dim, out_dim)), "bq": _b(kg, out_dim),
                "wk": _w(kg, (out_dim, out_dim)), "bk": _b(kg, out_dim),
                "wv": _w(kg, (out_dim, out_dim)), "bv": _b(kg, out_dim),
                "wo": _w(kg, (out_dim, out_dim)), "bo": _b(kg, out_dim),
            }
            ffn = {
                "w1": _w(kg, (latent, out_dim)), "b1": _b(kg, latent),
                "w_dw": _w(kg, (latent, 3, 3)), "b_dw": _b(kg, latent),
                "w_pw": _w(kg, (latent, latent)), "b_pw": _b(kg, latent),
                "w2": _w(kg, (out_dim, latent)), "b2": _b(kg, out_dim),
            }
            layers.append({"attn": attn, "ffn": ffn})
        stages.append({
            "embed_w": _w(kg, (out_dim, in_dim, 3, 3)),
            "embed_b": _b(kg, out_dim),
            "layers": layers,
            "n_heads": n_heads[idx],
            "reduction": R,
        })
    return {"stages": stages}


# ------------------------------------------------------------------ main


if __name__ == "__main__":
    key = jax.random.PRNGKey(0)
    k_params, k_input = jax.random.split(key)

    # Small SegFormer-like config consistent with the module.
    channels = 3
    dims = (16, 32, 64, 128)
    n_heads = (1, 2, 4, 8)
    expansion = (4, 4, 4, 4)
    reduction_ratio = (4, 2, 2, 1)
    n_layers = (1, 1, 1, 1)

    params = init_mit_params(k_params, channels, dims, n_heads, expansion,
                             reduction_ratio, n_layers)
    x = jax.random.normal(k_input, (2, channels, 32, 32), jnp.float32)

    outs = mit_forward(x, params)
    outs = jax.block_until_ready(outs)

    expected_shapes = [
        (2, 16, 16, 16),
        (2, 32, 8, 8),
        (2, 64, 4, 4),
        (2, 128, 2, 2),
    ]
    assert [tuple(o.shape) for o in outs] == expected_shapes, [o.shape for o in outs]
    assert all(bool(jnp.all(jnp.isfinite(o))) for o in outs)

    print("KERNEL_OK")
</pallas_src>

<mosaic_0001>
module attributes {stable_mosaic.version = 11 : i64} {
  func.func @_mm_kernel(%arg0: i32, %arg1: i32, %arg2: i32, %arg3: memref<512x128xbf16, #tpu.memory_space<vmem>>, %arg4: memref<128x128xbf16, #tpu.memory_space<vmem>>, %arg5: memref<1x128xf32, #tpu.memory_space<vmem>>, %arg6: memref<512x128xf32, #tpu.memory_space<vmem>>) attributes {dimension_semantics = [#tpu.dimension_semantics<parallel>, #tpu.dimension_semantics<parallel>, #tpu.dimension_semantics<arbitrary>], iteration_bounds = array<i64: 1, 1, 1>, scalar_prefetch = 0 : i64, scratch_operands = 0 : i64, tpu.core_type = #tpu.core_type<tc>, window_params = [{transform_indices = @transform_0, window_bounds = array<i64: 512, 128>}, {transform_indices = @transform_1, window_bounds = array<i64: 128, 128>}, {transform_indices = @transform_2, window_bounds = array<i64: 1, 128>}, {transform_indices = @transform_3, window_bounds = array<i64: 512, 128>}]} {
    %c0_i32 = arith.constant 0 : i32
    %0 = arith.cmpi eq, %arg2, %c0_i32 : i32
    %1 = arith.extui %0 : i1 to i32
    %c0_i32_0 = arith.constant 0 : i32
    %2 = arith.cmpi ne, %1, %c0_i32_0 : i32
    scf.if %2 {
      %cst_10 = arith.constant 0.000000e+00 : f32
      %12 = vector.broadcast %cst_10 : f32 to vector<512x128xf32>
      %c0_11 = arith.constant 0 : index
      %c0_12 = arith.constant 0 : index
      %13 = vector.load %arg6[%c0_11, %c0_12] : memref<512x128xf32, #tpu.memory_space<vmem>>, vector<512x128xf32>
      tpu.vector_store %arg6[%c0_11, %c0_12], %12 {strides = array<i32>} : memref<512x128xf32, #tpu.memory_space<vmem>>, vector<512x128xf32>,
    } else {
    }
    %c0 = arith.constant 0 : index
    %c0_1 = arith.constant 0 : index
    %3 = vector.load %arg6[%c0, %c0_1] : memref<512x128xf32, #tpu.memory_space<vmem>>, vector<512x128xf32>
    %c0_2 = arith.constant 0 : index
    %c0_3 = arith.constant 0 : index
    %4 = vector.load %arg3[%c0_2, %c0_3] : memref<512x128xbf16, #tpu.memory_space<vmem>>, vector<512x128xbf16>
    %c0_4 = arith.constant 0 : index
    %c0_5 = arith.constant 0 : index
    %5 = vector.load %arg4[%c0_4, %c0_5] : memref<128x128xbf16, #tpu.memory_space<vmem>>, vector<128x128xbf16>
    %cst = arith.constant dense<0.000000e+00> : vector<512x128xf32>
    %6 = tpu.matmul %4, %5, %cst {dimension_numbers = #tpu.dot_dimension_numbers<[1], [0], [0], [1], [0, 0, 1, 1], [], []>} : vector<512x128xbf16>, vector<128x128xbf16>, vector<512x128xf32> -> vector<512x128xf32>
    %7 = arith.addf %3, %6 : vector<512x128xf32>
    %c0_6 = arith.constant 0 : index
    %c0_7 = arith.constant 0 : index
    %8 = vector.load %arg6[%c0_6, %c0_7] : memref<512x128xf32, #tpu.memory_space<vmem>>, vector<512x128xf32>
    tpu.vector_store %arg6[%c0_6, %c0_7], %7 {strides = array<i32>} : memref<512x128xf32, #tpu.memory_space<vmem>>, vector<512x128xf32>,
    %c0_i32_8 = arith.constant 0 : i32
    %9 = arith.cmpi eq, %arg2, %c0_i32_8 : i32
    %10 = arith.extui %9 : i1 to i32
    %c0_i32_9 = arith.constant 0 : i32
    %11 = arith.cmpi ne, %10, %c0_i32_9 : i32
    scf.if %11 {
      %c0_10 = arith.constant 0 : index
      %c0_11 = arith.constant 0 : index
      %12 = vector.load %arg6[%c0_10, %c0_11] : memref<512x128xf32, #tpu.memory_space<vmem>>, vector<512x128xf32>
      %c0_12 = arith.constant 0 : index
      %c0_13 = arith.constant 0 : index
      %13 = vector.load %arg5[%c0_12, %c0_13] : memref<1x128xf32, #tpu.memory_space<vmem>>, vector<1x128xf32>
      %14 = vector.broadcast %13 : vector<1x128xf32> to vector<512x128xf32>
      %15 = arith.addf %12, %14 : vector<512x128xf32>
      %c0_14 = arith.constant 0 : index
      %c0_15 = arith.constant 0 : index
      %16 = vector.load %arg6[%c0_14, %c0_15] : memref<512x128xf32, #tpu.memory_space<vmem>>, vector<512x128xf32>
      tpu.vector_store %arg6[%c0_14, %c0_15], %15 {strides = array<i32>} : memref<512x128xf32, #tpu.memory_space<vmem>>, vector<512x128xf32>,
    } else {
    }
    return
  }
  func.func @transform_0(%arg0: i32, %arg1: i32, %arg2: i32) -> (i32, i32) {
    %c0_i32 = arith.constant 0 : i32
    return %arg0, %arg2 : i32, i32
  }
  func.func @transform_1(%arg0: i32, %arg1: i32, %arg2: i32) -> (i32, i32) {
    %c0_i32 = arith.constant 0 : i32
    return %arg2, %arg1 : i32, i32
  }
  func.func @transform_2(%arg0: i32, %arg1: i32, %arg2: i32) -> (i32, i32) {
    %c0_i32 = arith.constant 0 : i32
    %c0_i32_0 = arith.constant 0 : i32
    return %c0_i32, %arg1 : i32, i32
  }
  func.func @transform_3(%arg0: i32, %arg1: i32, %arg2: i32) -> (i32, i32) {
    %c0_i32 = arith.constant 0 : i32
    return %arg0, %arg1 : i32, i32
  }
}

</mosaic_0001>

<bundles_post_ra>
// kernel: tpu_custom_call.1
= control target key start
LH: loop header
LB: loop body
LE: loop exit
PB: predicated region body
PF: predicated region fallthrough
CT: control target
= control target key end

     0   :  { %8 = vsyncpa [#allocation3], 0  ;;  %s1529_s0 = inlined_call_operand.hbm [shape: bf16[512,128], index: 0, kind: input, shape index: {}]   ;;  %s1530_s1 = inlined_call_operand.hbm [shape: bf16[128,128], index: 1, kind: input, shape index: {}]   ;;  %s1531_s2 = inlined_call_operand.vmem [shape: f32[1,128], index: 2, kind: input, shape index: {}]   ;;  %s1532_s3 = inlined_call_operand.hbm [shape: f32[512,128], index: 3, kind: output, shape index: {}]  }
   0x1   :  { %9 = vsyncpa [#allocation6], 0 }
   0x2   :  { %10 = vsyncpa [#allocation4], 0  ;;  %s1424_s12 = smov [#allocation2]  }
   0x3   :  { %s16_s13 = sshll.u32 %s1424_s12, 4  ;;  %s17_s13 = int_to_ptr.vmem [resolvable:$true] %s16_s13 }
   0x4   :  { %s1366_s14 = scalar_lea.vmem %s17_s13, 4096  ;;  %p1371_p1 = scmp.lt.s32.totalorder %s17_s13, %s17_s13 }
   0x5   :  { %p1367_p0 = scmp.ne.s32.totalorder %s17_s13, %s1366_s14  ;;  %p1372_p2 = scmp.lt.s32.totalorder %s1366_s14, %s1366_s14 }
   0x7   :  { %p1373_p3 = por %p1372_p2, %p1371_p1 }
   0x9   :  { %p1374_p4 = pnand %p1373_p3, %p1367_p0 }
   0xb   :  { %1377 = shalt.err (!%p1374_p4)
}
   0xc   :  { %s1425_s15 = smov 64   ;;  %s1426_s16 = smov 4  }
   0xd   :  { %22 = dma.hbm_to_vmem [thread:$0]  %s1529_s0, 4096, %s17_s13, [#allocation3], %s1425_s15, %s1425_s15, %s1426_s16  }
   0xe   :  { %s1427_s19 = smov [#allocation5]  }
   0xf   :  { %s28_s20 = sshll.u32 %s1427_s19, 4  ;;  %s29_s20 = int_to_ptr.vmem [resolvable:$true] %s28_s20 }
  0x10   :  { %s1386_s21 = scalar_lea.vmem %s29_s20, 1024  ;;  %p1391_p6 = scmp.lt.s32.totalorder %s29_s20, %s29_s20 }
  0x11   :  { %p1387_p5 = scmp.ne.s32.totalorder %s29_s20, %s1386_s21  ;;  %p1392_p7 = scmp.lt.s32.totalorder %s1386_s21, %s1386_s21 }
  0x13   :  { %p1393_p8 = por %p1392_p7, %p1391_p6 }
  0x15   :  { %p1394_p9 = pnand %p1393_p8, %p1387_p5 }
  0x17   :  { %1397 = shalt.err (!%p1394_p9)
}
  0x18   :  { %34 = dma.hbm_to_vmem [thread:$0]  %s1530_s1, 1024, %s29_s20, [#allocation6], %s1425_s15, %s1425_s15, %s1426_s16  }
  0x19   :  { %1418 = dma.done.wait [#allocation3], 4096  }
  0x1a   :  { %1419 = vsyncadd [#allocation3], 4294963200 }
  0x1b   :  { %1420 = dma.done.wait [#allocation6], 1024  }
  0x1c   :  { %1421 = vsyncadd [#allocation6], 4294966272  ;;  %v1318_v0 = vld [vmem:[#allocation5 + $0x38] sm:$0xff]   ;;  %v1319_v1 = vld [vmem:[#allocation5 + $0x30] sm:$0xff]  }
  0x1d   :  { %1214 = vmatprep.subr.bf16.mxu0 %v1318_v0  ;;  %1294 = vmatprep.subr.bf16.mxu1 %v1318_v0  ;;  %v1320_v2 = vld [vmem:[#allocation5 + $0x28] sm:$0xff]   ;;  %v1321_v3 = vld [vmem:[#allocation5 + $0x20] sm:$0xff]   ;;  %v1322_v6 = vld [vmem:[#allocation5 + $0x18] sm:$0xff]  }
  0x1e   :  { %1215 = vmatpush3.bf16.msra.mxu0 %v1318_v0  ;;  %1302 = vmatpush3.bf16.msra.mxu1 %v1318_v0  ;;  %v1326_v4 = vld [vmem:[#allocation2] sm:$0xff]   ;;  %v1323_v7 = vld [vmem:[#allocation5 + $0x10] sm:$0xff]   ;;  %v1324_v8 = vld [vmem:[#allocation5 + $0x8] sm:$0xff]  }
  0x1f   :  { %1216 = vmatprep.subr.bf16.mxu0 %v1319_v1  ;;  %1295 = vmatprep.subr.bf16.mxu1 %v1319_v1  ;;  %v1327_v5 = vld [vmem:[#allocation2 + $0x80] sm:$0xff]   ;;  %v1328_v10 = vld [vmem:[#allocation2 + $0x8] sm:$0xff]   ;;  %v1330_v12 = vld [vmem:[#allocation2 + $0x10] sm:$0xff]  }
  0x20   :  { %1230 = vmatprep.mubr.bf16.mxu0 %v1326_v4  ;;  %1262 = vmatprep.mubr.bf16.mxu1 %v1327_v5  ;;  %v1325_v9 = vld [vmem:[#allocation5] sm:$0xff]   ;;  %v1329_v11 = vld [vmem:[#allocation2 + $0x88] sm:$0xff]   ;;  %v1331_v13 = vld [vmem:[#allocation2 + $0x90] sm:$0xff]  }
  0x21   :  { %v1332_v14 = vld [vmem:[#allocation2 + $0x18] sm:$0xff]   ;;  %v1334_v16 = vld [vmem:[#allocation2 + $0x20] sm:$0xff]   ;;  %v1336_v18 = vld [vmem:[#allocation2 + $0x28] sm:$0xff]  }
  0x22   :  { %1217 = vmatpush3.bf16.msra.mxu0 %v1319_v1  ;;  %1303 = vmatpush3.bf16.msra.mxu1 %v1319_v1  ;;  %v1333_v15 = vld [vmem:[#allocation2 + $0x98] sm:$0xff]   ;;  %v1335_v17 = vld [vmem:[#allocation2 + $0xa0] sm:$0xff]   ;;  %v1337_v19 = vld [vmem:[#allocation2 + $0xa8] sm:$0xff]  }
  0x23   :  { %1218 = vmatprep.subr.bf16.mxu0 %v1320_v2  ;;  %1296 = vmatprep.subr.bf16.mxu1 %v1320_v2  ;;  %v1338_v20 = vld [vmem:[#allocation2 + $0x30] sm:$0xff]   ;;  %v1340_v22 = vld [vmem:[#allocation2 + $0x38] sm:$0xff]   ;;  %v1342_v24 = vld [vmem:[#allocation2 + $0x40] sm:$0xff]  }
  0x24   :  { %v1339_v21 = vld [vmem:[#allocation2 + $0xb0] sm:$0xff]   ;;  %v1341_v23 = vld [vmem:[#allocation2 + $0xb8] sm:$0xff]   ;;  %v1343_v25 = vld [vmem:[#allocation2 + $0xc0] sm:$0xff]  }
  0x25   :  { %v1344_v26 = vld [vmem:[#allocation2 + $0x48] sm:$0xff]   ;;  %v1346_v28 = vld [vmem:[#allocation2 + $0x50] sm:$0xff]   ;;  %v1348_v30 = vld [vmem:[#allocation2 + $0x58] sm:$0xff]  }
  0x26   :  { %1219 = vmatpush3.bf16.msra.mxu0 %v1320_v2  ;;  %1304 = vmatpush3.bf16.msra.mxu1 %v1320_v2  ;;  %v1345_v27 = vld [vmem:[#allocation2 + $0xc8] sm:$0xff]   ;;  %v1347_v29 = vld [vmem:[#allocation2 + $0xd0] sm:$0xff]   ;;  %v1349_v31 = vld [vmem:[#allocation2 + $0xd8] sm:$0xff]  }
  0x27   :  { %1220 = vmatprep.subr.bf16.mxu0 %v1321_v3  ;;  %1297 = vmatprep.subr.bf16.mxu1 %v1321_v3  ;;  %v1350_v32 = vld [vmem:[#allocation2 + $0x60] sm:$0xff]   ;;  %v1352_v34 = vld [vmem:[#allocation2 + $0x68] sm:$0xff]   ;;  %v1354_v36 = vld [vmem:[#allocation2 + $0x70] sm:$0xff]  }
  0x28   :  { %v1351_v33 = vld [vmem:[#allocation2 + $0xe0] sm:$0xff]   ;;  %v1353_v35 = vld [vmem:[#allocation2 + $0xe8] sm:$0xff]   ;;  %v1355_v37 = vld [vmem:[#allocation2 + $0xf0] sm:$0xff]  }
  0x29   :  { %v1356_v38 = vld [vmem:[#allocation2 + $0x78] sm:$0xff]   ;;  %v1460_v41 = vld [vmem:[%s1531_s2] ss:$0 sm:$0xff]  ;;  %s1428_s2 = smov [#allocation7]  }
  0x2a   :  { %1221 = vmatpush3.bf16.msra.mxu0 %v1321_v3  ;;  %1305 = vmatpush3.bf16.msra.mxu1 %v1321_v3  ;;  %v1357_v39 = vld [vmem:[#allocation2 + $0xf8] sm:$0xff]   ;;  %s1120_s24 = sshll.u32 %s1428_s2, 4  ;;  %s1121_s24 = int_to_ptr.vmem [resolvable:$true] %s1120_s24 }
  0x2b   :  { %1222 = vmatprep.subr.bf16.mxu0 %v1322_v6  ;;  %1298 = vmatprep.subr.bf16.mxu1 %v1322_v6  ;;  %s1398_s25 = scalar_lea.vmem %s1121_s24, 8192  ;;  %p1403_p11 = scmp.lt.s32.totalorder %s1121_s24, %s1121_s24 }
  0x2c   :  { %p1399_p10 = scmp.ne.s32.totalorder %s1121_s24, %s1398_s25  ;;  %p1404_p12 = scmp.lt.s32.totalorder %s1398_s25, %s1398_s25 }
  0x2e   :  { %1223 = vmatpush3.bf16.msra.mxu0 %v1322_v6  ;;  %1306 = vmatpush3.bf16.msra.mxu1 %v1322_v6  ;;  %p1405_p13 = por %p1404_p12, %p1403_p11 }
  0x2f   :  { %1224 = vmatprep.subr.bf16.mxu0 %v1323_v7  ;;  %1299 = vmatprep.subr.bf16.mxu1 %v1323_v7 }
  0x30   :  { %p1406_p0 = pnand %p1405_p13, %p1399_p10 }
  0x32   :  { %1225 = vmatpush3.bf16.msra.mxu0 %v1323_v7  ;;  %1307 = vmatpush3.bf16.msra.mxu1 %v1323_v7 }
  0x33   :  { %1226 = vmatprep.subr.bf16.mxu0 %v1324_v8  ;;  %1300 = vmatprep.subr.bf16.mxu1 %v1324_v8 }
  0x36   :  { %1227 = vmatpush3.bf16.msra.mxu0 %v1324_v8  ;;  %1308 = vmatpush3.bf16.msra.mxu1 %v1324_v8 }
  0x37   :  { %1228 = vmatprep.subr.bf16.mxu0 %v1325_v9  ;;  %1301 = vmatprep.subr.bf16.mxu1 %v1325_v9 }
  0x3a   :  { %1229 = vmatpush3.bf16.msra.mxu0 %v1325_v9  ;;  %1309 = vmatpush3.bf16.msra.mxu1 %v1325_v9 }
  0x3d   :  { %1231 = vmatmul.mubr.bf16.vlgmr.msra.gmra.mxu0 %v1328_v10  ;;  %1263 = vmatmul.mubr.bf16.vlgmr.msra.gmra.mxu1 %v1329_v11 }
  0x3e   :  { %1234 = vmatprep.mubr.bf16.mxu0 %v1330_v12  ;;  %1266 = vmatprep.mubr.bf16.mxu1 %v1331_v13 }
  0x45   :  { %1235 = vmatmul.mubr.bf16.gmra.mxu0 %v1332_v14  ;;  %1267 = vmatmul.mubr.bf16.gmra.mxu1 %v1333_v15 }
  0x46   :  { %1238 = vmatprep.mubr.bf16.mxu0 %v1334_v16  ;;  %1270 = vmatprep.mubr.bf16.mxu1 %v1335_v17 }
  0x4d   :  { %1239 = vmatmul.mubr.bf16.gmra.mxu0 %v1336_v18  ;;  %1271 = vmatmul.mubr.bf16.gmra.mxu1 %v1337_v19 }
  0x4e   :  { %1242 = vmatprep.mubr.bf16.mxu0 %v1338_v20  ;;  %1274 = vmatprep.mubr.bf16.mxu1 %v1339_v21 }
  0x55   :  { %1243 = vmatmul.mubr.bf16.gmra.mxu0 %v1340_v22  ;;  %1275 = vmatmul.mubr.bf16.gmra.mxu1 %v1341_v23 }
  0x56   :  { %1246 = vmatprep.mubr.bf16.mxu0 %v1342_v24  ;;  %1278 = vmatprep.mubr.bf16.mxu1 %v1343_v25 }
  0x5d   :  { %1247 = vmatmul.mubr.bf16.gmra.mxu0 %v1344_v26  ;;  %1279 = vmatmul.mubr.bf16.gmra.mxu1 %v1345_v27 }
  0x5e   :  { %1250 = vmatprep.mubr.bf16.mxu0 %v1346_v28  ;;  %1282 = vmatprep.mubr.bf16.mxu1 %v1347_v29 }
  0x65   :  { %1251 = vmatmul.mubr.bf16.gmra.mxu0 %v1348_v30  ;;  %1283 = vmatmul.mubr.bf16.gmra.mxu1 %v1349_v31 }
  0x66   :  { %1254 = vmatprep.mubr.bf16.mxu0 %v1350_v32  ;;  %1286 = vmatprep.mubr.bf16.mxu1 %v1351_v33 }
  0x6d   :  { %1255 = vmatmul.mubr.bf16.gmra.mxu0 %v1352_v34  ;;  %1287 = vmatmul.mubr.bf16.gmra.mxu1 %v1353_v35 }
  0x6e   :  { %1258 = vmatprep.mubr.bf16.mxu0 %v1354_v36  ;;  %1290 = vmatprep.mubr.bf16.mxu1 %v1355_v37 }
  0x75   :  { %1259 = vmatmul.mubr.bf16.gmra.mxu0 %v1356_v38  ;;  %1291 = vmatmul.mubr.bf16.gmra.mxu1 %v1357_v39 }
  0xfd   :  { %v1232_v40 = vpop.f32.mrf.mxu0  ;;  %v1264_v42 = vpop.f32.mrf.mxu1 }
  0xfe   :  { %v989_v45 = vadd.f32 %v1232_v40, %v1460_v41  ;;  %v1021_v46 = vadd.f32 %v1264_v42, %v1460_v41 }
  0xff   :  { %v530_v43 = vpop.f32.mrf.mxu0  ;;  %v658_v44 = vpop.f32.mrf.mxu1 }
 0x100   :  { %1053 = vst [vmem:[#allocation7 + $0x10] sm:$0xff] %v989_v45  ;;  %1085 = vst [vmem:[#allocation7 + $0x110] sm:$0xff] %v1021_v46  ;;  %v987_v49 = vadd.f32 %v1460_v41, %v530_v43  ;;  %v1019_v50 = vadd.f32 %v1460_v41, %v658_v44 }
 0x101   :  { %v1233_v47 = vpop.f32.mrf.mxu0  ;;  %v1265_v48 = vpop.f32.mrf.mxu1 }
 0x102   :  { %1051 = vst [vmem:[#allocation7] sm:$0xff] %v987_v49  ;;  %1083 = vst [vmem:[#allocation7 + $0x100] sm:$0xff] %v1019_v50  ;;  %v990_v53 = vadd.f32 %v1233_v47, %v1460_v41  ;;  %v1022_v54 = vadd.f32 %v1265_v48, %v1460_v41 }
 0x103   :  { %v533_v51 = vpop.f32.mrf.mxu0  ;;  %v661_v52 = vpop.f32.mrf.mxu1 }
 0x104   :  { %1054 = vst [vmem:[#allocation7 + $0x18] sm:$0xff] %v990_v53  ;;  %1086 = vst [vmem:[#allocation7 + $0x118] sm:$0xff] %v1022_v54  ;;  %v988_v57 = vadd.f32 %v1460_v41, %v533_v51  ;;  %v1020_v58 = vadd.f32 %v1460_v41, %v661_v52 }
 0x105   :  { %v1236_v55 = vpop.f32.mrf.mxu0  ;;  %v1268_v56 = vpop.f32.mrf.mxu1 }
 0x106   :  { %1052 = vst [vmem:[#allocation7 + $0x8] sm:$0xff] %v988_v57  ;;  %1084 = vst [vmem:[#allocation7 + $0x108] sm:$0xff] %v1020_v58  ;;  %v993_v61 = vadd.f32 %v1236_v55, %v1460_v41  ;;  %v1025_v62 = vadd.f32 %v1268_v56, %v1460_v41 }
 0x107   :  { %v546_v59 = vpop.f32.mrf.mxu0  ;;  %v674_v60 = vpop.f32.mrf.mxu1 }
 0x108   :  { %1057 = vst [vmem:[#allocation7 + $0x30] sm:$0xff] %v993_v61  ;;  %1089 = vst [vmem:[#allocation7 + $0x130] sm:$0xff] %v1025_v62  ;;  %v991_v1 = vadd.f32 %v1460_v41, %v546_v59  ;;  %v1023_v2 = vadd.f32 %v1460_v41, %v674_v60 }
 0x109   :  { %v1237_v63 = vpop.f32.mrf.mxu0  ;;  %v1269_v0 = vpop.f32.mrf.mxu1 }
 0x10a   :  { %1055 = vst [vmem:[#allocation7 + $0x20] sm:$0xff] %v991_v1  ;;  %1087 = vst [vmem:[#allocation7 + $0x120] sm:$0xff] %v1023_v2  ;;  %v994_v5 = vadd.f32 %v1237_v63, %v1460_v41  ;;  %v1026_v6 = vadd.f32 %v1269_v0, %v1460_v41 }
 0x10b   :  { %v549_v3 = vpop.f32.mrf.mxu0  ;;  %v677_v4 = vpop.f32.mrf.mxu1 }
 0x10c   :  { %1058 = vst [vmem:[#allocation7 + $0x38] sm:$0xff] %v994_v5  ;;  %1090 = vst [vmem:[#allocation7 + $0x138] sm:$0xff] %v1026_v6  ;;  %v992_v9 = vadd.f32 %v1460_v41, %v549_v3  ;;  %v1024_v10 = vadd.f32 %v1460_v41, %v677_v4 }
 0x10d   :  { %v1240_v7 = vpop.f32.mrf.mxu0  ;;  %v1272_v8 = vpop.f32.mrf.mxu1 }
 0x10e   :  { %1056 = vst [vmem:[#allocation7 + $0x28] sm:$0xff] %v992_v9  ;;  %1088 = vst [vmem:[#allocation7 + $0x128] sm:$0xff] %v1024_v10  ;;  %v997_v13 = vadd.f32 %v1240_v7, %v1460_v41  ;;  %v1029_v14 = vadd.f32 %v1272_v8, %v1460_v41 }
 0x10f   :  { %v562_v11 = vpop.f32.mrf.mxu0  ;;  %v690_v12 = vpop.f32.mrf.mxu1 }
 0x110   :  { %1061 = vst [vmem:[#allocation7 + $0x50] sm:$0xff] %v997_v13  ;;  %1093 = vst [vmem:[#allocation7 + $0x150] sm:$0xff] %v1029_v14  ;;  %v995_v17 = vadd.f32 %v1460_v41, %v562_v11  ;;  %v1027_v18 = vadd.f32 %v1460_v41, %v690_v12 }
 0x111   :  { %v1241_v15 = vpop.f32.mrf.mxu0  ;;  %v1273_v16 = vpop.f32.mrf.mxu1 }
 0x112   :  { %1059 = vst [vmem:[#allocation7 + $0x40] sm:$0xff] %v995_v17  ;;  %1091 = vst [vmem:[#allocation7 + $0x140] sm:$0xff] %v1027_v18  ;;  %v998_v21 = vadd.f32 %v1241_v15, %v1460_v41  ;;  %v1030_v22 = vadd.f32 %v1273_v16, %v1460_v41 }
 0x113   :  { %v565_v19 = vpop.f32.mrf.mxu0  ;;  %v693_v20 = vpop.f32.mrf.mxu1 }
 0x114   :  { %1062 = vst [vmem:[#allocation7 + $0x58] sm:$0xff] %v998_v21  ;;  %1094 = vst [vmem:[#allocation7 + $0x158] sm:$0xff] %v1030_v22  ;;  %v996_v25 = vadd.f32 %v1460_v41, %v565_v19  ;;  %v1028_v26 = vadd.f32 %v1460_v41, %v693_v20 }
 0x115   :  { %v1244_v23 = vpop.f32.mrf.mxu0  ;;  %v1276_v24 = vpop.f32.mrf.mxu1 }
 0x116   :  { %1060 = vst [vmem:[#allocation7 + $0x48] sm:$0xff] %v996_v25  ;;  %1092 = vst [vmem:[#allocation7 + $0x148] sm:$0xff] %v1028_v26  ;;  %v1001_v29 = vadd.f32 %v1244_v23, %v1460_v41  ;;  %v1033_v30 = vadd.f32 %v1276_v24, %v1460_v41 }
 0x117   :  { %v578_v27 = vpop.f32.mrf.mxu0  ;;  %v706_v28 = vpop.f32.mrf.mxu1 }
 0x118   :  { %1065 = vst [vmem:[#allocation7 + $0x70] sm:$0xff] %v1001_v29  ;;  %1097 = vst [vmem:[#allocation7 + $0x170] sm:$0xff] %v1033_v30  ;;  %v999_v33 = vadd.f32 %v1460_v41, %v578_v27  ;;  %v1031_v34 = vadd.f32 %v1460_v41, %v706_v28 }
 0x119   :  { %v1245_v31 = vpop.f32.mrf.mxu0  ;;  %v1277_v32 = vpop.f32.mrf.mxu1 }
 0x11a   :  { %1063 = vst [vmem:[#allocation7 + $0x60] sm:$0xff] %v999_v33  ;;  %1095 = vst [vmem:[#allocation7 + $0x160] sm:$0xff] %v1031_v34  ;;  %v1002_v37 = vadd.f32 %v1245_v31, %v1460_v41  ;;  %v1034_v38 = vadd.f32 %v1277_v32, %v1460_v41 }
 0x11b   :  { %v581_v35 = vpop.f32.mrf.mxu0  ;;  %v709_v36 = vpop.f32.mrf.mxu1 }
 0x11c   :  { %1066 = vst [vmem:[#allocation7 + $0x78] sm:$0xff] %v1002_v37  ;;  %1098 = vst [vmem:[#allocation7 + $0x178] sm:$0xff] %v1034_v38  ;;  %v1000_v42 = vadd.f32 %v1460_v41, %v581_v35  ;;  %v1032_v43 = vadd.f32 %v1460_v41, %v709_v36 }
 0x11d   :  { %v1248_v39 = vpop.f32.mrf.mxu0  ;;  %v1280_v40 = vpop.f32.mrf.mxu1 }
 0x11e   :  { %1064 = vst [vmem:[#allocation7 + $0x68] sm:$0xff] %v1000_v42  ;;  %1096 = vst [vmem:[#allocation7 + $0x168] sm:$0xff] %v1032_v43  ;;  %v1005_v46 = vadd.f32 %v1248_v39, %v1460_v41  ;;  %v1037_v47 = vadd.f32 %v1280_v40, %v1460_v41 }
 0x11f   :  { %v594_v44 = vpop.f32.mrf.mxu0  ;;  %v722_v45 = vpop.f32.mrf.mxu1 }
 0x120   :  { %1069 = vst [vmem:[#allocation7 + $0x90] sm:$0xff] %v1005_v46  ;;  %1101 = vst [vmem:[#allocation7 + $0x190] sm:$0xff] %v1037_v47  ;;  %v1003_v50 = vadd.f32 %v1460_v41, %v594_v44  ;;  %v1035_v51 = vadd.f32 %v1460_v41, %v722_v45 }
 0x121   :  { %v1249_v48 = vpop.f32.mrf.mxu0  ;;  %v1281_v49 = vpop.f32.mrf.mxu1 }
 0x122   :  { %1067 = vst [vmem:[#allocation7 + $0x80] sm:$0xff] %v1003_v50  ;;  %1099 = vst [vmem:[#allocation7 + $0x180] sm:$0xff] %v1035_v51  ;;  %v1006_v54 = vadd.f32 %v1249_v48, %v1460_v41  ;;  %v1038_v55 = vadd.f32 %v1281_v49, %v1460_v41 }
 0x123   :  { %v597_v52 = vpop.f32.mrf.mxu0  ;;  %v725_v53 = vpop.f32.mrf.mxu1 }
 0x124   :  { %1070 = vst [vmem:[#allocation7 + $0x98] sm:$0xff] %v1006_v54  ;;  %1102 = vst [vmem:[#allocation7 + $0x198] sm:$0xff] %v1038_v55  ;;  %v1004_v58 = vadd.f32 %v1460_v41, %v597_v52  ;;  %v1036_v59 = vadd.f32 %v1460_v41, %v725_v53 }
 0x125   :  { %v1252_v56 = vpop.f32.mrf.mxu0  ;;  %v1284_v57 = vpop.f32.mrf.mxu1 }
 0x126   :  { %1068 = vst [vmem:[#allocation7 + $0x88] sm:$0xff] %v1004_v58  ;;  %1100 = vst [vmem:[#allocation7 + $0x188] sm:$0xff] %v1036_v59  ;;  %v1009_v62 = vadd.f32 %v1252_v56, %v1460_v41  ;;  %v1041_v63 = vadd.f32 %v1284_v57, %v1460_v41 }
 0x127   :  { %v610_v60 = vpop.f32.mrf.mxu0  ;;  %v738_v61 = vpop.f32.mrf.mxu1 }
 0x128   :  { %1073 = vst [vmem:[#allocation7 + $0xb0] sm:$0xff] %v1009_v62  ;;  %1105 = vst [vmem:[#allocation7 + $0x1b0] sm:$0xff] %v1041_v63  ;;  %v1007_v2 = vadd.f32 %v1460_v41, %v610_v60  ;;  %v1039_v3 = vadd.f32 %v1460_v41, %v738_v61 }
 0x129   :  { %v1253_v0 = vpop.f32.mrf.mxu0  ;;  %v1285_v1 = vpop.f32.mrf.mxu1 }
 0x12a   :  { %1071 = vst [vmem:[#allocation7 + $0xa0] sm:$0xff] %v1007_v2  ;;  %1103 = vst [vmem:[#allocation7 + $0x1a0] sm:$0xff] %v1039_v3  ;;  %v1010_v6 = vadd.f32 %v1253_v0, %v1460_v41  ;;  %v1042_v7 = vadd.f32 %v1285_v1, %v1460_v41 }
 0x12b   :  { %v613_v4 = vpop.f32.mrf.mxu0  ;;  %v741_v5 = vpop.f32.mrf.mxu1 }
 0x12c   :  { %1074 = vst [vmem:[#allocation7 + $0xb8] sm:$0xff] %v1010_v6  ;;  %1106 = vst [vmem:[#allocation7 + $0x1b8] sm:$0xff] %v1042_v7  ;;  %v1008_v10 = vadd.f32 %v1460_v41, %v613_v4  ;;  %v1040_v11 = vadd.f32 %v1460_v41, %v741_v5 }
 0x12d   :  { %v1256_v8 = vpop.f32.mrf.mxu0  ;;  %v1288_v9 = vpop.f32.mrf.mxu1 }
 0x12e   :  { %1072 = vst [vmem:[#allocation7 + $0xa8] sm:$0xff] %v1008_v10  ;;  %1104 = vst [vmem:[#allocation7 + $0x1a8] sm:$0xff] %v1040_v11  ;;  %v1013_v14 = vadd.f32 %v1256_v8, %v1460_v41  ;;  %v1045_v15 = vadd.f32 %v1288_v9, %v1460_v41 }
 0x12f   :  { %v626_v12 = vpop.f32.mrf.mxu0  ;;  %v754_v13 = vpop.f32.mrf.mxu1 }
 0x130   :  { %1077 = vst [vmem:[#allocation7 + $0xd0] sm:$0xff] %v1013_v14  ;;  %1109 = vst [vmem:[#allocation7 + $0x1d0] sm:$0xff] %v1045_v15  ;;  %v1011_v18 = vadd.f32 %v1460_v41, %v626_v12  ;;  %v1043_v19 = vadd.f32 %v1460_v41, %v754_v13 }
 0x131   :  { %v1257_v16 = vpop.f32.mrf.mxu0  ;;  %v1289_v17 = vpop.f32.mrf.mxu1 }
 0x132   :  { %1075 = vst [vmem:[#allocation7 + $0xc0] sm:$0xff] %v1011_v18  ;;  %1107 = vst [vmem:[#allocation7 + $0x1c0] sm:$0xff] %v1043_v19  ;;  %v1014_v22 = vadd.f32 %v1257_v16, %v1460_v41  ;;  %v1046_v23 = vadd.f32 %v1289_v17, %v1460_v41 }
 0x133   :  { %v629_v20 = vpop.f32.mrf.mxu0  ;;  %v757_v21 = vpop.f32.mrf.mxu1 }
 0x134   :  { %1078 = vst [vmem:[#allocation7 + $0xd8] sm:$0xff] %v1014_v22  ;;  %1110 = vst [vmem:[#allocation7 + $0x1d8] sm:$0xff] %v1046_v23  ;;  %v1012_v26 = vadd.f32 %v1460_v41, %v629_v20  ;;  %v1044_v27 = vadd.f32 %v1460_v41, %v757_v21 }
 0x135   :  { %v1260_v24 = vpop.f32.mrf.mxu0  ;;  %v1292_v25 = vpop.f32.mrf.mxu1 }
 0x136   :  { %1076 = vst [vmem:[#allocation7 + $0xc8] sm:$0xff] %v1012_v26  ;;  %1108 = vst [vmem:[#allocation7 + $0x1c8] sm:$0xff] %v1044_v27  ;;  %v1017_v30 = vadd.f32 %v1260_v24, %v1460_v41  ;;  %v1049_v31 = vadd.f32 %v1292_v25, %v1460_v41 }
 0x137   :  { %v642_v28 = vpop.f32.mrf.mxu0  ;;  %v770_v29 = vpop.f32.mrf.mxu1 }
 0x138   :  { %1081 = vst [vmem:[#allocation7 + $0xf0] sm:$0xff] %v1017_v30  ;;  %1113 = vst [vmem:[#allocation7 + $0x1f0] sm:$0xff] %v1049_v31  ;;  %v1015_v34 = vadd.f32 %v1460_v41, %v642_v28  ;;  %v1047_v35 = vadd.f32 %v1460_v41, %v770_v29 }
 0x139   :  { %v1261_v32 = vpop.f32.mrf.mxu0  ;;  %v1293_v33 = vpop.f32.mrf.mxu1 }
 0x13a   :  { %1079 = vst [vmem:[#allocation7 + $0xe0] sm:$0xff] %v1015_v34  ;;  %1111 = vst [vmem:[#allocation7 + $0x1e0] sm:$0xff] %v1047_v35  ;;  %v1018_v38 = vadd.f32 %v1261_v32, %v1460_v41  ;;  %v1050_v39 = vadd.f32 %v1293_v33, %v1460_v41 }
 0x13b   :  { %v645_v36 = vpop.f32.mrf.mxu0  ;;  %v773_v37 = vpop.f32.mrf.mxu1 }
 0x13c   :  { %1082 = vst [vmem:[#allocation7 + $0xf8] sm:$0xff] %v1018_v38  ;;  %1114 = vst [vmem:[#allocation7 + $0x1f8] sm:$0xff] %v1050_v39  ;;  %v1016_v40 = vadd.f32 %v1460_v41, %v645_v36  ;;  %v1048_v42 = vadd.f32 %v1460_v41, %v773_v37 }
 0x13e   :  { %1080 = vst [vmem:[#allocation7 + $0xe8] sm:$0xff] %v1016_v40  ;;  %1112 = vst [vmem:[#allocation7 + $0x1e8] sm:$0xff] %v1048_v42 }
 0x13f   :  { %1409 = shalt.err (!%p1406_p0)
}
 0x140   :  { %s1429_s26 = smov 128   ;;  %s1430_s27 = smov 8  }
 0x141   :  { %1126 = dma.vmem_to_hbm [thread:$0]  %s1121_s24, 8192, %s1532_s3, [#allocation4], %s1429_s26, %s1429_s26, %s1430_s27  }
 0x142   :  { %1422 = dma.done.wait [#allocation4], 8192  }
 0x143   :  { %1423 = vsyncadd [#allocation4], 4294959104 }
 0x144   :  { %1130 = vsyncpa [#allocation3], 1 }
 0x145   :  { %1131 = vsyncpa [#allocation6], 1 }
 0x146   :  { %1132 = vsyncpa [#allocation4], 1 }

</bundles_post_ra>
